<compile_context>
chip_gen: v7x
topology: tpu7x:2x2x1
jax: 0.10.0
libtpu: 0.0.40
codegen_flags: <defaults>
</compile_context>

<pallas_src>
import functools

import jax
import jax.numpy as jnp
from jax import lax
from jax.experimental import pallas as pl
from jax.experimental.pallas import tpu as pltpu


def _embed_position_kernel(tri_ref, x_ref, wp_ref, whh_ref, bp_ref, bhh_ref,
                           wr_ref, br_ref, y_ref, acar_ref, m_ref, s_ref,
                           *, d_hid, chunk, cumsum_bf16, n_tok_total):
    c = pl.program_id(1)

    # Reset the cross-chunk carries at the start of every batch element.
    @pl.when(c == 0)
    def _():
        acar_ref[...] = jnp.zeros((1, d_hid), jnp.float32)   # carried cumsum(log_p)
        m_ref[...] = jnp.zeros((1, d_hid), jnp.float32)      # running max   (v0 = 0)
        s_ref[...] = jnp.ones((1, d_hid), jnp.float32)       # running sum   (exp(0))

    x = x_ref[0]                                             # (C, d_emb)
    xw = x.astype(wp_ref.dtype)

    # ---- H(x), split into the two output halves (no (C, 2*d_hid) temporary) ---
    zp = (jnp.dot(xw, wp_ref[...], preferred_element_type=jnp.float32)
          + bp_ref[...])                                     # (C, d_hid)
    h = (jnp.dot(xw, whh_ref[...], preferred_element_type=jnp.float32)
         + bhh_ref[...])                                     # (C, d_hid)
    # logsigmoid(zp) = min(zp, 0) - log1p(exp(-|zp|))
    log_p = jnp.minimum(zp, 0.0) - jnp.log1p(jnp.exp(-jnp.abs(zp)))

    tri = tri_ref[...]                                       # (C, C) f32, resident

    # ---- cumsum(log_p) over tokens: tri matmul + carried offset (kept f32) ----
    A = acar_ref[...] + jnp.dot(tri, log_p, preferred_element_type=jnp.float32)
    u = h - A                                                # (C, d_hid)

    # ---- blocked, numerically-stable logcumsumexp -----------------------------
    M = m_ref[...]                                           # (1, d_hid)
    S = s_ref[...]                                           # (1, d_hid)

    if n_tok_total is not None:
        # Tail masking: padded rows (token index >= n_tok) must not inflate the
        # running max nor contribute to the exp-cumsum (0 * inf = NaN in the MXU).
        row = lax.broadcasted_iota(jnp.int32, (chunk, 1), 0)
        valid = (row + c * chunk) < n_tok_total              # (C, 1) bool
    else:
        valid = None

    u_max = u if valid is None else jnp.where(valid, u, -jnp.inf)
    m_new = jnp.maximum(M, jnp.max(u_max, axis=0, keepdims=True))
    e = jnp.exp(u - m_new)                                   # (C, d_hid), in [0, 1]
    if valid is not None:
        e = jnp.where(valid, e, 0.0)

    if cumsum_bf16:
        # bf16 operands, f32 accumulation: native MXU pass, ~3x cheaper than f32.
        cs = jnp.dot(tri.astype(jnp.bfloat16), e.astype(jnp.bfloat16),
                     preferred_element_type=jnp.float32)
    else:
        cs = jnp.dot(tri, e, preferred_element_type=jnp.float32)

    base = S * jnp.exp(M - m_new)                            # carried sum, rescaled
    s_rec = A + m_new + jnp.log(base + cs)                   # (C, d_hid)

    # ---- update carries for the next chunk ------------------------------------
    acar_ref[...] = A[chunk - 1:chunk, :]
    m_ref[...] = m_new
    s_ref[...] = base + cs[chunk - 1:chunk, :]

    # ---- y = x + R(s) ----------------------------------------------------------
    y = (x.astype(jnp.float32)
         + jnp.dot(s_rec.astype(wr_ref.dtype), wr_ref[...],
                   preferred_element_type=jnp.float32)
         + br_ref[...])
    y_ref[0] = y.astype(y_ref.dtype)


def _round_up(a, b):
    return (a + b - 1) // b * b


def _default_max_chunk():
    """128 on v5e (128-wide MXU, small scoped VMEM), 256 on v6e/v7x."""
    try:
        kind = jax.devices()[0].device_kind.lower()
    except Exception:
        return 256
    if "v5 lite" in kind or "v5lite" in kind or "v5e" in kind:
        return 128
    return 256


def _vmem_limit_bytes(C, d_emb, d_hid, in_itemsize, out_itemsize, resident_bytes):
    stream = 2 * C * d_emb * (in_itemsize + out_itemsize)        # 2x-buffered x / y chunks
    temps = 4 * (8 * C * d_hid + 3 * C * d_emb + 2 * C * C)      # live f32 temporaries (rough)
    scratch = 3 * 8 * 128 * 4                                    # padded (1, d_hid) carries
    est = 2 * resident_bytes + stream + temps + scratch          # assume 2x-buffered residents
    return int(min(64 * 2 ** 20, max(32 * 2 ** 20, 2 * est)))    # >= default, <= v7x physical


def embed_position(x, wh, bh, wr, br, d_hid, *, use_bf16_matmul=True, max_chunk=None):
    B, n_tok, d_emb = x.shape
    if max_chunk is None:
        max_chunk = _default_max_chunk()
    max_chunk = max(8, (max_chunk // 8) * 8)

    # Chunk the token axis; pad n_tok up to a multiple of C (tail rows are masked
    # in-kernel and sliced off here) so VMEM stays O(C^2 + C*d_emb) for any n_tok.
    C = min(max_chunk, _round_up(n_tok, 8))
    n_pad = _round_up(n_tok, C)
    n_chunks = n_pad // C
    padded = n_pad != n_tok
    x_in = jnp.pad(x, ((0, 0), (0, n_pad - n_tok), (0, 0))) if padded else x

    # Split H's weight/bias on the host so the kernel never lane-slices z.
    wp, whh = wh[:, :d_hid], wh[:, d_hid:]
    bp = bh[:, :d_hid].astype(jnp.float32)
    bhh = bh[:, d_hid:].astype(jnp.float32)
    br32 = br.astype(jnp.float32)
    if use_bf16_matmul:
        wp = wp.astype(jnp.bfloat16)
        whh = whh.astype(jnp.bfloat16)
        wr_k = wr.astype(jnp.bfloat16)
    else:
        wr_k = wr

    # Triangular mask built once on the host; constant index_map keeps it resident.
    tri = jnp.tril(jnp.ones((C, C), jnp.float32))

    resident_bytes = sum(int(a.size) * a.dtype.itemsize
                         for a in (tri, wp, whh, bp, bhh, wr_k, br32))
    vmem_limit = _vmem_limit_bytes(C, d_emb, d_hid,
                                   x_in.dtype.itemsize, x.dtype.itemsize,
                                   resident_bytes)

    kernel = functools.partial(
        _embed_position_kernel,
        d_hid=d_hid, chunk=C,
        cumsum_bf16=use_bf16_matmul,
        n_tok_total=(n_tok if padded else None))

    def run(resident_mode):
        kw = {} if resident_mode is None else {"pipeline_mode": resident_mode}

        def rspec(a):
            nd = a.ndim
            return pl.BlockSpec(a.shape, lambda b, c: (0,) * nd, **kw)

        return pl.pallas_call(
            kernel,
            out_shape=jax.ShapeDtypeStruct((B, n_pad, d_emb), x.dtype),
            grid=(B, n_chunks),
            in_specs=[
                rspec(tri),                                           # tri (resident)
                pl.BlockSpec((1, C, d_emb), lambda b, c: (b, c, 0)),  # x chunk (streamed)
                rspec(wp), rspec(whh), rspec(bp), rspec(bhh),         # H weights/biases
                rspec(wr_k), rspec(br32),                             # R weight/bias
            ],
            out_specs=pl.BlockSpec((1, C, d_emb), lambda b, c: (b, c, 0)),
            scratch_shapes=[
                pltpu.VMEM((1, d_hid), jnp.float32),   # carried cumsum(log_p)
                pltpu.VMEM((1, d_hid), jnp.float32),   # running max M
                pltpu.VMEM((1, d_hid), jnp.float32),   # running scaled sum S
            ],
            compiler_params=pltpu.CompilerParams(
                dimension_semantics=("parallel", "arbitrary"),
                vmem_limit_bytes=vmem_limit),
        )(tri, x_in, wp, whh, bp, bhh, wr_k, br32)

    buffered = getattr(pl, "Buffered", None)
    if buffered is not None:
        try:
            y = run(buffered(1))   # single-buffer resident operands (constant index_map)
        except Exception:
            # Fallback for jax versions where single-buffer pipeline_mode is unsupported.
            y = run(None)
    else:
        y = run(None)

    return y[:, :n_tok, :] if padded else y


def ref_forward(x, wh, bh, wr, br, d_hid):
    """Pure-JAX reference mirroring the PyTorch module (using_prev_context=False)."""
    z = x @ wh + bh
    log_p = jax.nn.log_sigmoid(z[..., :d_hid])
    h = z[..., d_hid:]
    a_star = jnp.pad(jnp.cumsum(log_p, axis=-2), ((0, 0), (1, 0), (0, 0)))
    v = jnp.pad(h, ((0, 0), (1, 0), (0, 0))) - a_star
    m = jnp.max(v, axis=-2, keepdims=True)
    lcse = jnp.log(jnp.cumsum(jnp.exp(v - m), axis=-2)) + m
    s = (a_star + lcse)[..., 1:, :]
    return x + s @ wr + br


if __name__ == "__main__":
    B, n_tok, d_emb, d_hid = 2, 8, 32, 16

    key = jax.random.PRNGKey(0)
    k1, k2, k3, k4, k5 = jax.random.split(key, 5)
    wh = jax.random.normal(k1, (d_emb, 2 * d_hid), jnp.float32) * (d_emb ** -0.5)
    bh = jax.random.normal(k2, (1, 2 * d_hid), jnp.float32) * 0.02
    wr = jax.random.normal(k3, (d_hid, d_emb), jnp.float32) * (d_hid ** -0.5)
    br = jax.random.normal(k4, (1, d_emb), jnp.float32) * 0.02
    x = jax.random.normal(k5, (B, n_tok, d_emb), jnp.float32)

    y_ref = ref_forward(x, wh, bh, wr, br, d_hid)

    # 1) Full-precision path: tight check vs the f32 reference.
    y_f32 = jax.block_until_ready(
        embed_position(x, wh, bh, wr, br, d_hid, use_bf16_matmul=False))
    assert y_f32.shape == (B, n_tok, d_emb) and y_f32.dtype == x.dtype
    assert jnp.allclose(y_f32, y_ref, atol=1e-4, rtol=1e-4), "f32 path mismatch"

    # 2) Default bf16-MXU path (bf16 weights + bf16 e-cumsum): looser tolerance.
    y_bf16 = jax.block_until_ready(embed_position(x, wh, bh, wr, br, d_hid))
    assert jnp.allclose(y_bf16, y_ref, atol=5e-2, rtol=5e-2), "bf16 path mismatch"

    # 3) Multi-chunk path (exercises the cross-chunk carries): n_tok=32, chunk=16.
    x2 = jax.random.normal(jax.random.fold_in(key, 7), (B, 32, d_emb), jnp.float32)
    y2 = jax.block_until_ready(
        embed_position(x2, wh, bh, wr, br, d_hid, use_bf16_matmul=False, max_chunk=16))
    y2_ref = ref_forward(x2, wh, bh, wr, br, d_hid)
    assert jnp.allclose(y2, y2_ref, atol=1e-4, rtol=1e-4), "chunked path mismatch"

    # 4) Ragged n_tok (padding + in-kernel tail masking): n_tok=20, chunk=16.
    x3 = jax.random.normal(jax.random.fold_in(key, 11), (B, 20, d_emb), jnp.float32)
    y3 = jax.block_until_ready(
        embed_position(x3, wh, bh, wr, br, d_hid, use_bf16_matmul=False, max_chunk=16))
    y3_ref = ref_forward(x3, wh, bh, wr, br, d_hid)
    assert y3.shape == (B, 20, d_emb)
    assert jnp.allclose(y3, y3_ref, atol=1e-4, rtol=1e-4), "padded-tail path mismatch"

    # 5) bf16 activation streaming (x/y in bf16; recurrence & carries stay f32).
    x_bf = x.astype(jnp.bfloat16)
    y_bf = jax.block_until_ready(embed_position(x_bf, wh, bh, wr, br, d_hid))
    assert y_bf.dtype == jnp.bfloat16
    y_bf_ref = ref_forward(x_bf.astype(jnp.float32), wh, bh, wr, br, d_hid)
    assert jnp.allclose(y_bf.astype(jnp.float32), y_bf_ref, atol=2e-1, rtol=1e-1), \
        "bf16 activation path mismatch"

    print("KERNEL_OK")
</pallas_src>

<mosaic_0001>
module attributes {stable_mosaic.version = 11 : i64} {
  func.func @_embed_position_kernel(%arg0: i32, %arg1: i32, %arg2: memref<8x8xf32, #tpu.memory_space<vmem>>, %arg3: memref<1x8x32xf32, #tpu.memory_space<vmem>>, %arg4: memref<32x16xf32, #tpu.memory_space<vmem>>, %arg5: memref<32x16xf32, #tpu.memory_space<vmem>>, %arg6: memref<1x16xf32, #tpu.memory_space<vmem>>, %arg7: memref<1x16xf32, #tpu.memory_space<vmem>>, %arg8: memref<16x32xf32, #tpu.memory_space<vmem>>, %arg9: memref<1x32xf32, #tpu.memory_space<vmem>>, %arg10: memref<1x8x32xf32, #tpu.memory_space<vmem>>, %arg11: memref<1x16xf32, #tpu.memory_space<vmem>>, %arg12: memref<1x16xf32, #tpu.memory_space<vmem>>, %arg13: memref<1x16xf32, #tpu.memory_space<vmem>>) attributes {dimension_semantics = [#tpu.dimension_semantics<parallel>, #tpu.dimension_semantics<arbitrary>], iteration_bounds = array<i64: 2, 1>, scalar_prefetch = 0 : i64, scratch_operands = 3 : i64, tpu.core_type = #tpu.core_type<tc>, window_params = [{pipeline_mode = #tpu.pipeline_mode<synchronous>, transform_indices = @transform_0, window_bounds = array<i64: 8, 8>}, {transform_indices = @transform_1, window_bounds = array<i64: 1, 8, 32>}, {pipeline_mode = #tpu.pipeline_mode<synchronous>, transform_indices = @transform_2, window_bounds = array<i64: 32, 16>}, {pipeline_mode = #tpu.pipeline_mode<synchronous>, transform_indices = @transform_3, window_bounds = array<i64: 32, 16>}, {pipeline_mode = #tpu.pipeline_mode<synchronous>, transform_indices = @transform_4, window_bounds = array<i64: 1, 16>}, {pipeline_mode = #tpu.pipeline_mode<synchronous>, transform_indices = @transform_5, window_bounds = array<i64: 1, 16>}, {pipeline_mode = #tpu.pipeline_mode<synchronous>, transform_indices = @transform_6, window_bounds = array<i64: 16, 32>}, {pipeline_mode = #tpu.pipeline_mode<synchronous>, transform_indices = @transform_7, window_bounds = array<i64: 1, 32>}, {transform_indices = @transform_8, window_bounds = array<i64: 1, 8, 32>}]} {
    %c0_i32 = arith.constant 0 : i32
    %0 = arith.cmpi eq, %arg1, %c0_i32 : i32
    %1 = arith.extui %0 : i1 to i32
    %c0_i32_0 = arith.constant 0 : i32
    %2 = arith.cmpi ne, %1, %c0_i32_0 : i32
    scf.if %2 {
      %cst_39 = arith.constant 0.000000e+00 : f32
      %62 = vector.broadcast %cst_39 : f32 to vector<1x16xf32>
      %c0_40 = arith.constant 0 : index
      %c0_41 = arith.constant 0 : index
      %63 = vector.load %arg11[%c0_40, %c0_41] : memref<1x16xf32, #tpu.memory_space<vmem>>, vector<1x16xf32>
      tpu.vector_store %arg11[%c0_40, %c0_41], %62 {strides = array<i32>} : memref<1x16xf32, #tpu.memory_space<vmem>>, vector<1x16xf32>,
      %cst_42 = arith.constant 0.000000e+00 : f32
      %64 = vector.broadcast %cst_42 : f32 to vector<1x16xf32>
      %c0_43 = arith.constant 0 : index
      %c0_44 = arith.constant 0 : index
      %65 = vector.load %arg12[%c0_43, %c0_44] : memref<1x16xf32, #tpu.memory_space<vmem>>, vector<1x16xf32>
      tpu.vector_store %arg12[%c0_43, %c0_44], %64 {strides = array<i32>} : memref<1x16xf32, #tpu.memory_space<vmem>>, vector<1x16xf32>,
      %cst_45 = arith.constant 1.000000e+00 : f32
      %66 = vector.broadcast %cst_45 : f32 to vector<1x16xf32>
      %c0_46 = arith.constant 0 : index
      %c0_47 = arith.constant 0 : index
      %67 = vector.load %arg13[%c0_46, %c0_47] : memref<1x16xf32, #tpu.memory_space<vmem>>, vector<1x16xf32>
      tpu.vector_store %arg13[%c0_46, %c0_47], %66 {strides = array<i32>} : memref<1x16xf32, #tpu.memory_space<vmem>>, vector<1x16xf32>,
    } else {
    }
    %c0 = arith.constant 0 : index
    %c0_1 = arith.constant 0 : index
    %c0_2 = arith.constant 0 : index
    %3 = vector.load %arg3[%c0, %c0_1, %c0_2] : memref<1x8x32xf32, #tpu.memory_space<vmem>>, vector<1x8x32xf32>
    %4 = vector.shape_cast %3 : vector<1x8x32xf32> to vector<8x32xf32>
    %c0_3 = arith.constant 0 : index
    %c0_4 = arith.constant 0 : index
    %5 = vector.load %arg4[%c0_3, %c0_4] : memref<32x16xf32, #tpu.memory_space<vmem>>, vector<32x16xf32>
    %cst = arith.constant dense<0.000000e+00> : vector<8x16xf32>
    %6 = tpu.matmul %4, %5, %cst {dimension_numbers = #tpu.dot_dimension_numbers<[1], [0], [0], [1], [0, 0, 1, 1], [], []>} : vector<8x32xf32>, vector<32x16xf32>, vector<8x16xf32> -> vector<8x16xf32>
    %c0_5 = arith.constant 0 : index
    %c0_6 = arith.constant 0 : index
    %7 = vector.load %arg6[%c0_5, %c0_6] : memref<1x16xf32, #tpu.memory_space<vmem>>, vector<1x16xf32>
    %8 = vector.broadcast %7 : vector<1x16xf32> to vector<8x16xf32>
    %9 = arith.addf %6, %8 : vector<8x16xf32>
    %c0_7 = arith.constant 0 : index
    %c0_8 = arith.constant 0 : index
    %10 = vector.load %arg5[%c0_7, %c0_8] : memref<32x16xf32, #tpu.memory_space<vmem>>, vector<32x16xf32>
    %cst_9 = arith.constant dense<0.000000e+00> : vector<8x16xf32>
    %11 = tpu.matmul %4, %10, %cst_9 {dimension_numbers = #tpu.dot_dimension_numbers<[1], [0], [0], [1], [0, 0, 1, 1], [], []>} : vector<8x32xf32>, vector<32x16xf32>, vector<8x16xf32> -> vector<8x16xf32>
    %c0_10 = arith.constant 0 : index
    %c0_11 = arith.constant 0 : index
    %12 = vector.load %arg7[%c0_10, %c0_11] : memref<1x16xf32, #tpu.memory_space<vmem>>, vector<1x16xf32>
    %13 = vector.broadcast %12 : vector<1x16xf32> to vector<8x16xf32>
    %14 = arith.addf %11, %13 : vector<8x16xf32>
    %cst_12 = arith.constant 0.000000e+00 : f32
    %15 = vector.broadcast %cst_12 : f32 to vector<8x16xf32>
    %16 = arith.minimumf %9, %15 : vector<8x16xf32>
    %17 = math.absf %9 : vector<8x16xf32>
    %cst_13 = arith.constant 0.000000e+00 : f32
    %18 = vector.broadcast %cst_13 : f32 to vector<8x16xf32>
    %19 = arith.subf %18, %17 : vector<8x16xf32>
    %20 = math.exp %19 : vector<8x16xf32>
    %21 = math.log1p %20 : vector<8x16xf32>
    %22 = arith.subf %16, %21 : vector<8x16xf32>
    %c0_14 = arith.constant 0 : index
    %c0_15 = arith.constant 0 : index
    %23 = vector.load %arg2[%c0_14, %c0_15] : memref<8x8xf32, #tpu.memory_space<vmem>>, vector<8x8xf32>
    %c0_16 = arith.constant 0 : index
    %c0_17 = arith.constant 0 : index
    %24 = vector.load %arg11[%c0_16, %c0_17] : memref<1x16xf32, #tpu.memory_space<vmem>>, vector<1x16xf32>
    %cst_18 = arith.constant dense<0.000000e+00> : vector<8x16xf32>
    %25 = tpu.matmul %23, %22, %cst_18 {dimension_numbers = #tpu.dot_dimension_numbers<[1], [0], [0], [1], [0, 0, 1, 1], [], []>} : vector<8x8xf32>, vector<8x16xf32>, vector<8x16xf32> -> vector<8x16xf32>
    %26 = vector.broadcast %24 : vector<1x16xf32> to vector<8x16xf32>
    %27 = arith.addf %26, %25 : vector<8x16xf32>
    %28 = arith.subf %14, %27 : vector<8x16xf32>
    %c0_19 = arith.constant 0 : index
    %c0_20 = arith.constant 0 : index
    %29 = vector.load %arg12[%c0_19, %c0_20] : memref<1x16xf32, #tpu.memory_space<vmem>>, vector<1x16xf32>
    %c0_21 = arith.constant 0 : index
    %c0_22 = arith.constant 0 : index
    %30 = vector.load %arg13[%c0_21, %c0_22] : memref<1x16xf32, #tpu.memory_space<vmem>>, vector<1x16xf32>
    %cst_23 = arith.constant dense<0xFF800000> : vector<16xf32>
    %31 = vector.multi_reduction <maximumf>, %28, %cst_23 [0] : vector<8x16xf32> to vector<16xf32>
    %32 = vector.shape_cast %31 : vector<16xf32> to vector<1x16xf32>
    %33 = arith.maximumf %29, %32 : vector<1x16xf32>
    %34 = vector.broadcast %33 : vector<1x16xf32> to vector<8x16xf32>
    %35 = arith.subf %28, %34 : vector<8x16xf32>
    %36 = math.exp %35 : vector<8x16xf32>
    %cst_24 = arith.constant dense<0.000000e+00> : vector<8x16xf32>
    %37 = tpu.matmul %23, %36, %cst_24 {dimension_numbers = #tpu.dot_dimension_numbers<[1], [0], [0], [1], [0, 0, 1, 1], [], []>} : vector<8x8xf32>, vector<8x16xf32>, vector<8x16xf32> -> vector<8x16xf32>
    %38 = arith.subf %29, %33 : vector<1x16xf32>
    %39 = math.exp %38 : vector<1x16xf32>
    %40 = arith.mulf %30, %39 : vector<1x16xf32>
    %41 = vector.broadcast %33 : vector<1x16xf32> to vector<8x16xf32>
    %42 = arith.addf %27, %41 : vector<8x16xf32>
    %43 = vector.broadcast %40 : vector<1x16xf32> to vector<8x16xf32>
    %44 = arith.addf %43, %37 : vector<8x16xf32>
    %45 = math.log %44 : vector<8x16xf32>
    %46 = arith.addf %42, %45 : vector<8x16xf32>
    %47 = vector.extract_strided_slice %27 {offsets = [7, 0], sizes = [1, 16], strides = [1, 1]} : vector<8x16xf32> to vector<1x16xf32>
    %c0_25 = arith.constant 0 : index
    %c0_26 = arith.constant 0 : index
    %48 = vector.load %arg11[%c0_25, %c0_26] : memref<1x16xf32, #tpu.memory_space<vmem>>, vector<1x16xf32>
    tpu.vector_store %arg11[%c0_25, %c0_26], %47 {strides = array<i32>} : memref<1x16xf32, #tpu.memory_space<vmem>>, vector<1x16xf32>,
    %c0_27 = arith.constant 0 : index
    %c0_28 = arith.constant 0 : index
    %49 = vector.load %arg12[%c0_27, %c0_28] : memref<1x16xf32, #tpu.memory_space<vmem>>, vector<1x16xf32>
    tpu.vector_store %arg12[%c0_27, %c0_28], %33 {strides = array<i32>} : memref<1x16xf32, #tpu.memory_space<vmem>>, vector<1x16xf32>,
    %50 = vector.extract_strided_slice %37 {offsets = [7, 0], sizes = [1, 16], strides = [1, 1]} : vector<8x16xf32> to vector<1x16xf32>
    %51 = arith.addf %40, %50 : vector<1x16xf32>
    %c0_29 = arith.constant 0 : index
    %c0_30 = arith.constant 0 : index
    %52 = vector.load %arg13[%c0_29, %c0_30] : memref<1x16xf32, #tpu.memory_space<vmem>>, vector<1x16xf32>
    tpu.vector_store %arg13[%c0_29, %c0_30], %51 {strides = array<i32>} : memref<1x16xf32, #tpu.memory_space<vmem>>, vector<1x16xf32>,
    %c0_31 = arith.constant 0 : index
    %c0_32 = arith.constant 0 : index
    %53 = vector.load %arg8[%c0_31, %c0_32] : memref<16x32xf32, #tpu.memory_space<vmem>>, vector<16x32xf32>
    %cst_33 = arith.constant dense<0.000000e+00> : vector<8x32xf32>
    %54 = tpu.matmul %46, %53, %cst_33 {dimension_numbers = #tpu.dot_dimension_numbers<[1], [0], [0], [1], [0, 0, 1, 1], [], []>} : vector<8x16xf32>, vector<16x32xf32>, vector<8x32xf32> -> vector<8x32xf32>
    %55 = arith.addf %4, %54 : vector<8x32xf32>
    %c0_34 = arith.constant 0 : index
    %c0_35 = arith.constant 0 : index
    %56 = vector.load %arg9[%c0_34, %c0_35] : memref<1x32xf32, #tpu.memory_space<vmem>>, vector<1x32xf32>
    %57 = vector.broadcast %56 : vector<1x32xf32> to vector<8x32xf32>
    %58 = arith.addf %55, %57 : vector<8x32xf32>
    %c0_36 = arith.constant 0 : index
    %c0_37 = arith.constant 0 : index
    %c0_38 = arith.constant 0 : index
    %59 = vector.load %arg10[%c0_36, %c0_37, %c0_38] : memref<1x8x32xf32, #tpu.memory_space<vmem>>, vector<1x8x32xf32>
    %60 = vector.shape_cast %59 : vector<1x8x32xf32> to vector<8x32xf32>
    %61 = vector.shape_cast %58 : vector<8x32xf32> to vector<1x8x32xf32>
    tpu.vector_store %arg10[%c0_36, %c0_37, %c0_38], %61 {strides = array<i32>} : memref<1x8x32xf32, #tpu.memory_space<vmem>>, vector<1x8x32xf32>,
    return
  }
  func.func @transform_0(%arg0: i32, %arg1: i32) -> (i32, i32) {
    %c0_i32 = arith.constant 0 : i32
    %c0_i32_0 = arith.constant 0 : i32
    %c0_i32_1 = arith.constant 0 : i32
    return %c0_i32, %c0_i32_0 : i32, i32
  }
  func.func @transform_1(%arg0: i32, %arg1: i32) -> (i32, i32, i32) {
    %c0_i32 = arith.constant 0 : i32
    %c0_i32_0 = arith.constant 0 : i32
    return %arg0, %arg1, %c0_i32 : i32, i32, i32
  }
  func.func @transform_2(%arg0: i32, %arg1: i32) -> (i32, i32) {
    %c0_i32 = arith.constant 0 : i32
    %c0_i32_0 = arith.constant 0 : i32
    %c0_i32_1 = arith.constant 0 : i32
    return %c0_i32, %c0_i32_0 : i32, i32
  }
  func.func @transform_3(%arg0: i32, %arg1: i32) -> (i32, i32) {
    %c0_i32 = arith.constant 0 : i32
    %c0_i32_0 = arith.constant 0 : i32
    %c0_i32_1 = arith.constant 0 : i32
    return %c0_i32, %c0_i32_0 : i32, i32
  }
  func.func @transform_4(%arg0: i32, %arg1: i32) -> (i32, i32) {
    %c0_i32 = arith.constant 0 : i32
    %c0_i32_0 = arith.constant 0 : i32
    %c0_i32_1 = arith.constant 0 : i32
    return %c0_i32, %c0_i32_0 : i32, i32
  }
  func.func @transform_5(%arg0: i32, %arg1: i32) -> (i32, i32) {
    %c0_i32 = arith.constant 0 : i32
    %c0_i32_0 = arith.constant 0 : i32
    %c0_i32_1 = arith.constant 0 : i32
    return %c0_i32, %c0_i32_0 : i32, i32
  }
  func.func @transform_6(%arg0: i32, %arg1: i32) -> (i32, i32) {
    %c0_i32 = arith.constant 0 : i32
    %c0_i32_0 = arith.constant 0 : i32
    %c0_i32_1 = arith.constant 0 : i32
    return %c0_i32, %c0_i32_0 : i32, i32
  }
  func.func @transform_7(%arg0: i32, %arg1: i32) -> (i32, i32) {
    %c0_i32 = arith.constant 0 : i32
    %c0_i32_0 = arith.constant 0 : i32
    %c0_i32_1 = arith.constant 0 : i32
    return %c0_i32, %c0_i32_0 : i32, i32
  }
  func.func @transform_8(%arg0: i32, %arg1: i32) -> (i32, i32, i32) {
    %c0_i32 = arith.constant 0 : i32
    %c0_i32_0 = arith.constant 0 : i32
    return %arg0, %arg1, %c0_i32 : i32, i32, i32
  }
}

module attributes {stable_mosaic.version = 11 : i64} {
  func.func @_embed_position_kernel(%arg0: i32, %arg1: i32, %arg2: memref<8x8xf32, #tpu.memory_space<vmem>>, %arg3: memref<1x8x32xf32, #tpu.memory_space<vmem>>, %arg4: memref<32x16xf32, #tpu.memory_space<vmem>>, %arg5: memref<32x16xf32, #tpu.memory_space<vmem>>, %arg6: memref<1x16xf32, #tpu.memory_space<vmem>>, %arg7: memref<1x16xf32, #tpu.memory_space<vmem>>, %arg8: memref<16x32xf32, #tpu.memory_space<vmem>>, %arg9: memref<1x32xf32, #tpu.memory_space<vmem>>, %arg10: memref<1x8x32xf32, #tpu.memory_space<vmem>>, %arg11: memref<1x16xf32, #tpu.memory_space<vmem>>, %arg12: memref<1x16xf32, #tpu.memory_space<vmem>>, %arg13: memref<1x16xf32, #tpu.memory_space<vmem>>) attributes {dimension_semantics = [#tpu.dimension_semantics<parallel>, #tpu.dimension_semantics<arbitrary>], iteration_bounds = array<i64: 2, 1>, scalar_prefetch = 0 : i64, scratch_operands = 3 : i64, tpu.core_type = #tpu.core_type<tc>, window_params = [{pipeline_mode = #tpu.pipeline_mode<synchronous>, transform_indices = @transform_0, window_bounds = array<i64: 8, 8>}, {transform_indices = @transform_1, window_bounds = array<i64: 1, 8, 32>}, {pipeline_mode = #tpu.pipeline_mode<synchronous>, transform_indices = @transform_2, window_bounds = array<i64: 32, 16>}, {pipeline_mode = #tpu.pipeline_mode<synchronous>, transform_indices = @transform_3, window_bounds = array<i64: 32, 16>}, {pipeline_mode = #tpu.pipeline_mode<synchronous>, transform_indices = @transform_4, window_bounds = array<i64: 1, 16>}, {pipeline_mode = #tpu.pipeline_mode<synchronous>, transform_indices = @transform_5, window_bounds = array<i64: 1, 16>}, {pipeline_mode = #tpu.pipeline_mode<synchronous>, transform_indices = @transform_6, window_bounds = array<i64: 16, 32>}, {pipeline_mode = #tpu.pipeline_mode<synchronous>, transform_indices = @transform_7, window_bounds = array<i64: 1, 32>}, {transform_indices = @transform_8, window_bounds = array<i64: 1, 8, 32>}]} {
    %c0_i32 = arith.constant 0 : i32
    %0 = arith.cmpi eq, %arg1, %c0_i32 : i32
    %1 = arith.extui %0 : i1 to i32
    %c0_i32_0 = arith.constant 0 : i32
    %2 = arith.cmpi ne, %1, %c0_i32_0 : i32
    scf.if %2 {
      %cst_39 = arith.constant 0.000000e+00 : f32
      %62 = vector.broadcast %cst_39 : f32 to vector<1x16xf32>
      %c0_40 = arith.constant 0 : index
      %c0_41 = arith.constant 0 : index
      %63 = vector.load %arg11[%c0_40, %c0_41] : memref<1x16xf32, #tpu.memory_space<vmem>>, vector<1x16xf32>
      tpu.vector_store %arg11[%c0_40, %c0_41], %62 {strides = array<i32>} : memref<1x16xf32, #tpu.memory_space<vmem>>, vector<1x16xf32>,
      %cst_42 = arith.constant 0.000000e+00 : f32
      %64 = vector.broadcast %cst_42 : f32 to vector<1x16xf32>
      %c0_43 = arith.constant 0 : index
      %c0_44 = arith.constant 0 : index
      %65 = vector.load %arg12[%c0_43, %c0_44] : memref<1x16xf32, #tpu.memory_space<vmem>>, vector<1x16xf32>
      tpu.vector_store %arg12[%c0_43, %c0_44], %64 {strides = array<i32>} : memref<1x16xf32, #tpu.memory_space<vmem>>, vector<1x16xf32>,
      %cst_45 = arith.constant 1.000000e+00 : f32
      %66 = vector.broadcast %cst_45 : f32 to vector<1x16xf32>
      %c0_46 = arith.constant 0 : index
      %c0_47 = arith.constant 0 : index
      %67 = vector.load %arg13[%c0_46, %c0_47] : memref<1x16xf32, #tpu.memory_space<vmem>>, vector<1x16xf32>
      tpu.vector_store %arg13[%c0_46, %c0_47], %66 {strides = array<i32>} : memref<1x16xf32, #tpu.memory_space<vmem>>, vector<1x16xf32>,
    } else {
    }
    %c0 = arith.constant 0 : index
    %c0_1 = arith.constant 0 : index
    %c0_2 = arith.constant 0 : index
    %3 = vector.load %arg3[%c0, %c0_1, %c0_2] : memref<1x8x32xf32, #tpu.memory_space<vmem>>, vector<1x8x32xf32>
    %4 = vector.shape_cast %3 : vector<1x8x32xf32> to vector<8x32xf32>
    %c0_3 = arith.constant 0 : index
    %c0_4 = arith.constant 0 : index
    %5 = vector.load %arg4[%c0_3, %c0_4] : memref<32x16xf32, #tpu.memory_space<vmem>>, vector<32x16xf32>
    %cst = arith.constant dense<0.000000e+00> : vector<8x16xf32>
    %6 = tpu.matmul %4, %5, %cst {dimension_numbers = #tpu.dot_dimension_numbers<[1], [0], [0], [1], [0, 0, 1, 1], [], []>} : vector<8x32xf32>, vector<32x16xf32>, vector<8x16xf32> -> vector<8x16xf32>
    %c0_5 = arith.constant 0 : index
    %c0_6 = arith.constant 0 : index
    %7 = vector.load %arg6[%c0_5, %c0_6] : memref<1x16xf32, #tpu.memory_space<vmem>>, vector<1x16xf32>
    %8 = vector.broadcast %7 : vector<1x16xf32> to vector<8x16xf32>
    %9 = arith.addf %6, %8 : vector<8x16xf32>
    %c0_7 = arith.constant 0 : index
    %c0_8 = arith.constant 0 : index
    %10 = vector.load %arg5[%c0_7, %c0_8] : memref<32x16xf32, #tpu.memory_space<vmem>>, vector<32x16xf32>
    %cst_9 = arith.constant dense<0.000000e+00> : vector<8x16xf32>
    %11 = tpu.matmul %4, %10, %cst_9 {dimension_numbers = #tpu.dot_dimension_numbers<[1], [0], [0], [1], [0, 0, 1, 1], [], []>} : vector<8x32xf32>, vector<32x16xf32>, vector<8x16xf32> -> vector<8x16xf32>
    %c0_10 = arith.constant 0 : index
    %c0_11 = arith.constant 0 : index
    %12 = vector.load %arg7[%c0_10, %c0_11] : memref<1x16xf32, #tpu.memory_space<vmem>>, vector<1x16xf32>
    %13 = vector.broadcast %12 : vector<1x16xf32> to vector<8x16xf32>
    %14 = arith.addf %11, %13 : vector<8x16xf32>
    %cst_12 = arith.constant 0.000000e+00 : f32
    %15 = vector.broadcast %cst_12 : f32 to vector<8x16xf32>
    %16 = arith.minimumf %9, %15 : vector<8x16xf32>
    %17 = math.absf %9 : vector<8x16xf32>
    %cst_13 = arith.constant 0.000000e+00 : f32
    %18 = vector.broadcast %cst_13 : f32 to vector<8x16xf32>
    %19 = arith.subf %18, %17 : vector<8x16xf32>
    %20 = math.exp %19 : vector<8x16xf32>
    %21 = math.log1p %20 : vector<8x16xf32>
    %22 = arith.subf %16, %21 : vector<8x16xf32>
    %c0_14 = arith.constant 0 : index
    %c0_15 = arith.constant 0 : index
    %23 = vector.load %arg2[%c0_14, %c0_15] : memref<8x8xf32, #tpu.memory_space<vmem>>, vector<8x8xf32>
    %c0_16 = arith.constant 0 : index
    %c0_17 = arith.constant 0 : index
    %24 = vector.load %arg11[%c0_16, %c0_17] : memref<1x16xf32, #tpu.memory_space<vmem>>, vector<1x16xf32>
    %cst_18 = arith.constant dense<0.000000e+00> : vector<8x16xf32>
    %25 = tpu.matmul %23, %22, %cst_18 {dimension_numbers = #tpu.dot_dimension_numbers<[1], [0], [0], [1], [0, 0, 1, 1], [], []>} : vector<8x8xf32>, vector<8x16xf32>, vector<8x16xf32> -> vector<8x16xf32>
    %26 = vector.broadcast %24 : vector<1x16xf32> to vector<8x16xf32>
    %27 = arith.addf %26, %25 : vector<8x16xf32>
    %28 = arith.subf %14, %27 : vector<8x16xf32>
    %c0_19 = arith.constant 0 : index
    %c0_20 = arith.constant 0 : index
    %29 = vector.load %arg12[%c0_19, %c0_20] : memref<1x16xf32, #tpu.memory_space<vmem>>, vector<1x16xf32>
    %c0_21 = arith.constant 0 : index
    %c0_22 = arith.constant 0 : index
    %30 = vector.load %arg13[%c0_21, %c0_22] : memref<1x16xf32, #tpu.memory_space<vmem>>, vector<1x16xf32>
    %cst_23 = arith.constant dense<0xFF800000> : vector<16xf32>
    %31 = vector.multi_reduction <maximumf>, %28, %cst_23 [0] : vector<8x16xf32> to vector<16xf32>
    %32 = vector.shape_cast %31 : vector<16xf32> to vector<1x16xf32>
    %33 = arith.maximumf %29, %32 : vector<1x16xf32>
    %34 = vector.broadcast %33 : vector<1x16xf32> to vector<8x16xf32>
    %35 = arith.subf %28, %34 : vector<8x16xf32>
    %36 = math.exp %35 : vector<8x16xf32>
    %cst_24 = arith.constant dense<0.000000e+00> : vector<8x16xf32>
    %37 = tpu.matmul %23, %36, %cst_24 {dimension_numbers = #tpu.dot_dimension_numbers<[1], [0], [0], [1], [0, 0, 1, 1], [], []>} : vector<8x8xf32>, vector<8x16xf32>, vector<8x16xf32> -> vector<8x16xf32>
    %38 = arith.subf %29, %33 : vector<1x16xf32>
    %39 = math.exp %38 : vector<1x16xf32>
    %40 = arith.mulf %30, %39 : vector<1x16xf32>
    %41 = vector.broadcast %33 : vector<1x16xf32> to vector<8x16xf32>
    %42 = arith.addf %27, %41 : vector<8x16xf32>
    %43 = vector.broadcast %40 : vector<1x16xf32> to vector<8x16xf32>
    %44 = arith.addf %43, %37 : vector<8x16xf32>
    %45 = math.log %44 : vector<8x16xf32>
    %46 = arith.addf %42, %45 : vector<8x16xf32>
    %47 = vector.extract_strided_slice %27 {offsets = [7, 0], sizes = [1, 16], strides = [1, 1]} : vector<8x16xf32> to vector<1x16xf32>
    %c0_25 = arith.constant 0 : index
    %c0_26 = arith.constant 0 : index
    %48 = vector.load %arg11[%c0_25, %c0_26] : memref<1x16xf32, #tpu.memory_space<vmem>>, vector<1x16xf32>
    tpu.vector_store %arg11[%c0_25, %c0_26], %47 {strides = array<i32>} : memref<1x16xf32, #tpu.memory_space<vmem>>, vector<1x16xf32>,
    %c0_27 = arith.constant 0 : index
    %c0_28 = arith.constant 0 : index
    %49 = vector.load %arg12[%c0_27, %c0_28] : memref<1x16xf32, #tpu.memory_space<vmem>>, vector<1x16xf32>
    tpu.vector_store %arg12[%c0_27, %c0_28], %33 {strides = array<i32>} : memref<1x16xf32, #tpu.memory_space<vmem>>, vector<1x16xf32>,
    %50 = vector.extract_strided_slice %37 {offsets = [7, 0], sizes = [1, 16], strides = [1, 1]} : vector<8x16xf32> to vector<1x16xf32>
    %51 = arith.addf %40, %50 : vector<1x16xf32>
    %c0_29 = arith.constant 0 : index
    %c0_30 = arith.constant 0 : index
    %52 = vector.load %arg13[%c0_29, %c0_30] : memref<1x16xf32, #tpu.memory_space<vmem>>, vector<1x16xf32>
    tpu.vector_store %arg13[%c0_29, %c0_30], %51 {strides = array<i32>} : memref<1x16xf32, #tpu.memory_space<vmem>>, vector<1x16xf32>,
    %c0_31 = arith.constant 0 : index
    %c0_32 = arith.constant 0 : index
    %53 = vector.load %arg8[%c0_31, %c0_32] : memref<16x32xf32, #tpu.memory_space<vmem>>, vector<16x32xf32>
    %cst_33 = arith.constant dense<0.000000e+00> : vector<8x32xf32>
    %54 = tpu.matmul %46, %53, %cst_33 {dimension_numbers = #tpu.dot_dimension_numbers<[1], [0], [0], [1], [0, 0, 1, 1], [], []>} : vector<8x16xf32>, vector<16x32xf32>, vector<8x32xf32> -> vector<8x32xf32>
    %55 = arith.addf %4, %54 : vector<8x32xf32>
    %c0_34 = arith.constant 0 : index
    %c0_35 = arith.constant 0 : index
    %56 = vector.load %arg9[%c0_34, %c0_35] : memref<1x32xf32, #tpu.memory_space<vmem>>, vector<1x32xf32>
    %57 = vector.broadcast %56 : vector<1x32xf32> to vector<8x32xf32>
    %58 = arith.addf %55, %57 : vector<8x32xf32>
    %c0_36 = arith.constant 0 : index
    %c0_37 = arith.constant 0 : index
    %c0_38 = arith.constant 0 : index
    %59 = vector.load %arg10[%c0_36, %c0_37, %c0_38] : memref<1x8x32xf32, #tpu.memory_space<vmem>>, vector<1x8x32xf32>
    %60 = vector.shape_cast %59 : vector<1x8x32xf32> to vector<8x32xf32>
    %61 = vector.shape_cast %58 : vector<8x32xf32> to vector<1x8x32xf32>
    tpu.vector_store %arg10[%c0_36, %c0_37, %c0_38], %61 {strides = array<i32>} : memref<1x8x32xf32, #tpu.memory_space<vmem>>, vector<1x8x32xf32>,
    return
  }
  func.func @transform_0(%arg0: i32, %arg1: i32) -> (i32, i32) {
    %c0_i32 = arith.constant 0 : i32
    %c0_i32_0 = arith.constant 0 : i32
    %c0_i32_1 = arith.constant 0 : i32
    return %c0_i32, %c0_i32_0 : i32, i32
  }
  func.func @transform_1(%arg0: i32, %arg1: i32) -> (i32, i32, i32) {
    %c0_i32 = arith.constant 0 : i32
    %c0_i32_0 = arith.constant 0 : i32
    return %arg0, %arg1, %c0_i32 : i32, i32, i32
  }
  func.func @transform_2(%arg0: i32, %arg1: i32) -> (i32, i32) {
    %c0_i32 = arith.constant 0 : i32
    %c0_i32_0 = arith.constant 0 : i32
    %c0_i32_1 = arith.constant 0 : i32
    return %c0_i32, %c0_i32_0 : i32, i32
  }
  func.func @transform_3(%arg0: i32, %arg1: i32) -> (i32, i32) {
    %c0_i32 = arith.constant 0 : i32
    %c0_i32_0 = arith.constant 0 : i32
    %c0_i32_1 = arith.constant 0 : i32
    return %c0_i32, %c0_i32_0 : i32, i32
  }
  func.func @transform_4(%arg0: i32, %arg1: i32) -> (i32, i32) {
    %c0_i32 = arith.constant 0 : i32
    %c0_i32_0 = arith.constant 0 : i32
    %c0_i32_1 = arith.constant 0 : i32
    return %c0_i32, %c0_i32_0 : i32, i32
  }
  func.func @transform_5(%arg0: i32, %arg1: i32) -> (i32, i32) {
    %c0_i32 = arith.constant 0 : i32
    %c0_i32_0 = arith.constant 0 : i32
    %c0_i32_1 = arith.constant 0 : i32
    return %c0_i32, %c0_i32_0 : i32, i32
  }
  func.func @transform_6(%arg0: i32, %arg1: i32) -> (i32, i32) {
    %c0_i32 = arith.constant 0 : i32
    %c0_i32_0 = arith.constant 0 : i32
    %c0_i32_1 = arith.constant 0 : i32
    return %c0_i32, %c0_i32_0 : i32, i32
  }
  func.func @transform_7(%arg0: i32, %arg1: i32) -> (i32, i32) {
    %c0_i32 = arith.constant 0 : i32
    %c0_i32_0 = arith.constant 0 : i32
    %c0_i32_1 = arith.constant 0 : i32
    return %c0_i32, %c0_i32_0 : i32, i32
  }
  func.func @transform_8(%arg0: i32, %arg1: i32) -> (i32, i32, i32) {
    %c0_i32 = arith.constant 0 : i32
    %c0_i32_0 = arith.constant 0 : i32
    return %arg0, %arg1, %c0_i32 : i32, i32, i32
  }
}

</mosaic_0001>

<bundles_post_ra>
// kernel: tpu_custom_call.1
= control target key start
LH: loop header
LB: loop body
LE: loop exit
PB: predicated region body
PF: predicated region fallthrough
CT: control target
= control target key end

     0   :  { %13 = vsyncpa [#allocation6], 0  ;;  %s1369_s0 = inlined_call_operand.vmem [shape: f32[8,8], index: 0, kind: input, shape index: {}]   ;;  %s1370_s1 = inlined_call_operand.vmem [shape: f32[2,8,32], index: 1, kind: input, shape index: {}]   ;;  %s1371_s2 = inlined_call_operand.vmem [shape: f32[32,16], index: 2, kind: input, shape index: {}]   ;;  %s1372_s3 = inlined_call_operand.vmem [shape: f32[32,16], index: 3, kind: input, shape index: {}]   ;;  %s1373_s4 = inlined_call_operand.vmem [shape: f32[1,16], index: 4, kind: input, shape index: {}]   ;;  %s1374_s5 = inlined_call_operand.vmem [shape: f32[1,16], index: 5, kind: input, shape index: {}]   ;;  %s1375_s6 = inlined_call_operand.vmem [shape: f32[16,32], index: 6, kind: input, shape index: {}]   ;;  %s1376_s7 = inlined_call_operand.vmem [shape: f32[1,32], index: 7, kind: input, shape index: {}]   ;;  %s1377_s8 = inlined_call_operand.hbm [shape: f32[2,8,32], index: 8, kind: output, shape index: {}]  }
   0x1   :  { %15 = vsyncpa [#allocation6 + $0x1], 0  ;;  %s1193_s27 = smov 0   ;;  %s1195_s28 = smov 0  }
   0x2   :  { %s1197_s29 = smov 0   ;;  %s1199_s30 = smov 0  }
   0x3   :  { %s1201_s9 = smov 0   ;;  %s1203_s10 = smov 0  }
   0x4 LB: > { %s901_s11 = sadd.s32 4294967295, %s1140_s10   ;;  %s902_s12 = sadd.s32 4294967294, %s1140_s10   ;;  %s1140_s10 = sphi %s1203_s10, %s21_s10   ;;  %s1136_s9 = sphi %s1201_s9, %s1384_s9   ;;  %s1132_s30 = sphi %s1199_s30, %s1383_s30   ;;  %s1128_s29 = sphi %s1197_s29, %s1382_s29   ;;  %s1124_s28 = sphi %s1195_s28, %s1381_s28   ;;  %s1120_s27 = sphi %s1193_s27, %s1380_s27  }
   0x5   : > { %s33_s13 = sadd.s32 1, %s1136_s9  ;;  %s217_s14 = sadd.s32 1, %s1128_s29 }
   0x6   : > { %p35_p0 = scmp.ge.s32.totalorder %s33_s13, 2  ;;  %p227_p1 = scmp.ne.s32.totalorder %s1128_s29, %s1124_s28 }
   0x7   : > { %p228_p2 = scmp.eq.s32.totalorder %s901_s11, 1  ;;  %p233_p3 = scmp.ne.s32.totalorder %s1124_s28, %s1120_s27 }
   0x8   : > { %s1386_s13 = smov (%p35_p0, %s33_s13), 0  ;;  %p234_p5 = scmp.eq.s32.totalorder %s902_s12, 1 }
   0x9   : > { %p1233_p4 = por %p228_p2, %p227_p1  ;;  %s212_s16 = ssub.s32 %s1136_s9, %s1386_s13 }
   0xa   : > { %p905_p6 = scmp.ge.s32.totalorder %s1140_s10, 1  ;;  %p215_p7 = scmp.eq.s32.totalorder %s212_s16, 0 }
   0xb   : > { %p1240_p8 = por %p234_p5, %p233_p3  ;;  %p283_p9 = scmp.lt.s32.totalorder %s1140_s10, 3 }
   0xc   : > { %s1246_s18 = scalar_select %p215_p7, %s1128_s29, %s217_s14  }
   0xd   : > { %p284_p10 = pnand %p905_p6, %p283_p9 }
   0xe   : > { %v335_v0 = vld [vmem:[%s1371_s2] sm:$0xff] (!%p284_p10)  ;;  %v336_v1 = vld [vmem:[%s1371_s2 + $0x8] sm:$0xff] (!%p284_p10)  ;;  %v337_v2 = vld [vmem:[%s1371_s2 + $0x10] sm:$0xff] (!%p284_p10)  ;;  %v1142_v3 = vmov (!%p284_p10), 0.0|0.0   ;;  %vm1143_vm0 = vmmov (!%p284_p10), 0   ;;  %v1144_v6 = vmov (!%p284_p10), 0.0   ;;  %v612_v47 = vlaneseq (!%p284_p10) }
   0xf   : > { %287 = sbr.rel (%p284_p10) target bundleno = 985 (0x3d9), region = 52  ;;  %977 = vmatprep.subr.bf16.mxu0 (!%p284_p10), %v1142_v3  ;;  %v978_v4 = vpack.c.bf16 (!%p284_p10), %v336_v1, %v335_v0  ;;  %v338_v5 = vld [vmem:[%s1371_s2 + $0x18] sm:$0xff] (!%p284_p10)  ;;  %946 = vmatprep.mubr.msk.f32.mxu0 (!%p284_p10), %vm1143_vm0, %v1144_v6  ;;  %p319_p11 = scmp.lt.s32.totalorder (!%p284_p10), %s1132_s30, 1  ;;  %vm346_vm1 = vcmask (!%p284_p10), 261120   ;;  %v420_v9 = vld [vmem:[%s1372_s3] sm:$0xff] (!%p284_p10)  ;;  %v421_v10 = vld [vmem:[%s1372_s3 + $0x8] sm:$0xff] (!%p284_p10) }
  0x10   : > { %983 = vmatprep.subr.bf16.mxu1 (!%p284_p10), %v1142_v3  ;;  %957 = vmatprep.mubr.msk.f32.mxu1 (!%p284_p10), %vm1143_vm0, %v1144_v6  ;;  %v981_v7 = vpack.c.bf16 (!%p284_p10), %v338_v5, %v337_v2  ;;  %v984_v11 = vpack.c.bf16 (!%p284_p10), %v421_v10, %v420_v9  ;;  %v422_v12 = vld [vmem:[%s1372_s3 + $0x10] sm:$0xff] (!%p284_p10)  ;;  %v423_v13 = vld [vmem:[%s1372_s3 + $0x18] sm:$0xff] (!%p284_p10)  ;;  %vm330_vm2 = vcmask (!%p284_p10), 122880   ;;  %v908_v15 = vld [vmem:[%s1373_s4] ss:$0 sm:$0xff] (!%p284_p10)  ;;  %vm518_vm4 = vcmask (!%p284_p10), 64512  }
  0x11   : > { %979 = vmatpush3.bf16.msra.mxu0 (!%p284_p10), %v978_v4  ;;  %v987_v14 = vpack.c.bf16 (!%p284_p10), %v423_v13, %v422_v12  ;;  %331 = vst.msk [vmem:[#allocation2] sm:$0x1] (!%p284_p10), %vm330_vm2, %v1144_v6  ;;  %332 = vst.msk [vmem:[#allocation3] sm:$0x1] (!%p284_p10), %vm330_vm2, %v1144_v6  ;;  %v516_v33 = vld [vmem:[%s1369_s0] sm:$0xff] (!%p284_p10)  ;;  %v1145_v36 = vmov (!%p284_p10), 1.0  }
  0x12   : > { %980 = vmatprep.subr.bf16.mxu0 (!%p284_p10), %v1142_v3  ;;  %985 = vmatpush3.bf16.msra.mxu1 (!%p284_p10), %v984_v11  ;;  %333 = vst.msk [vmem:[#allocation4] sm:$0x1] (!%p284_p10), %vm330_vm2, %v1145_v36  ;;  %v910_v37 = vld [vmem:[%s1374_s5] ss:$0 sm:$0xff] (!%p284_p10)  ;;  %vm705_vm5 = vcmask (!%p284_p10), 130055   ;;  %vm602_vm6 = vcmask (!%p284_p10), 130048  }
  0x13   : > { %986 = vmatprep.subr.bf16.mxu1 (!%p284_p10), %v1142_v3  ;;  %v613_v50 = vshrl.u32 (!%p284_p10), %v612_v47, 7  ;;  %v731_v4 = vld [vmem:[%s1375_s6 + $0x8] sm:$0xff] (!%p284_p10)  ;;  %s316_s26 = sand.u32 (!%p284_p10), 1, %s1124_s28   ;;  %s918_s16 = sshll.u32 (!%p284_p10), %s1132_s30, 7 }
  0x14   : > { %s1321_s23 = scalar_lea.hbm (!%p284_p10), %s1377_s8, %s918_s16  ;;  %s816_s24 = scalar_lea.sflag (!%p284_p10), [#allocation6], %s316_s26 }
  0x15   : > { %982 = vmatpush3.bf16.msra.mxu0 (!%p284_p10), %v981_v7  ;;  %v614_v54 = vsub.s32 (!%p284_p10), 0, %v613_v50  ;;  %s1147_s25 = smov (!%p284_p10), [#allocation5]  }
  0x16   : > { %s320_s11 = scalar_select %p319_p11, %s1132_s30, 1  ;;  %960 = vmatprep.subr.mxu0 %v1144_v6  ;;  %988 = vmatpush3.bf16.msra.mxu1 %v987_v14 }
  0x17   : > { %965 = vmatprep.subr.mxu1 %v1144_v6 }
  0x18   : > { %s907_s12 = sshll.u32 %s320_s11, 3  ;;  %v913_v38 = vld [vmem:[#allocation2] ss:$0 sm:$0xff]  ;;  %v600_v52 = vld [vmem:[#allocation3] sm:$0x1]  ;;  %s906_s11 = sshll.u32 %s316_s26, 3 }
  0x19   : > { %s325_s19 = scalar_lea.vmem %s1370_s1, %s907_s12  ;;  %v601_v62 = vld [vmem:[#allocation4] sm:$0x1] }
  0x1a   : > { %v1267_v8 = vld [vmem:[%s325_s19] sm:$0xff]  ;;  %s318_s19 = scalar_lea.vmem [#allocation5], %s906_s11  ;;  %s1066_s11 = sshll.u32 %s1147_s25, 4  ;;  %s1067_s11 = int_to_ptr.vmem [resolvable:$false] %s1066_s11 }
  0x1b   : > { %947 = vmatmul.mubr.msk.f32.vlgmr.msra.gmra.mrb[0].mxu0 %vm346_vm1, %v1267_v8  ;;  %958 = vmatmul.mubr.msk.f32.vlgmr.msra.gmra.mrb[0].mxu1 %vm346_vm1, %v1267_v8  ;;  %s830_s20 = sshll.u32 %s318_s19, 4  ;;  %s1068_s12 = scalar_lea.vmem %s1067_s11, 256  ;;  %s1323_s20 = int_to_ptr.vmem [resolvable:$true] %s830_s20 }
  0x1c   : > { %962 = vmatprep.mubr.msk.f32.mxu0 %vm1143_vm0, %v1144_v6  ;;  %967 = vmatprep.mubr.msk.f32.mxu1 %vm1143_vm0, %v1144_v6  ;;  %s1062_s30 = scalar_lea.vmem %s1323_s20, 128  ;;  %p1069_p1 = scmp.lt.s32.totalorder %s1323_s20, %s1067_s11 }
  0x1d   : > { %p1063_p12 = scmp.ne.s32.totalorder %s1323_s20, %s1062_s30  ;;  %p1070_p2 = scmp.lt.s32.totalorder %s1068_s12, %s1062_s30 }
  0x1f   : > { %p1064_p13 = pnand %p1063_p12, %p1233_p4  ;;  %p1071_p3 = por %p1070_p2, %p1069_p1 }
  0x21   : > { %p1065_p0 = pneg %p1064_p13 }
  0x23   : > { %p1072_p5 = pnand %p1071_p3, %p1065_p0 }
  0xee   : > { %v416_v16 = vpop.f32.mrb[0].mxu0  ;;  %v497_v34 = vpop.f32.mrb[0].mxu1 }
  0xef   : > { %v417_v17 = vadd.f32 %v908_v15, %v416_v16  ;;  %v948_v18 = vpop.f32.mrb[1].mxu0  ;;  %v959_v35 = vpop.f32.mrb[1].mxu1  ;;  %v498_v39 = vadd.f32 %v910_v37, %v497_v34 }
  0xf1   : > { %v502_v19 = vand.u32 2147483647, %v417_v17  ;;  %v501_v30 = vmin.f32 %v417_v17, 0.0 }
  0xf3   : > { %v503_v20 = vsub.f32 0.0, %v502_v19 }
  0xf5   : > { %v504_v21 = vmul.f32 1.442695, %v503_v20 }
  0xf7   : > { %1052 = vpow2.f32 %v504_v21 }
 0x101   : > { %v1053_v22 = vpop.eup %1052 }
 0x102   : > { %v506_v23 = vadd.f32 1.0, %v1053_v22  ;;  %v509_v24 = vmul.f32 -0.5, %v1053_v22  ;;  %v512_v26 = vand.u32 2147483647, %v1053_v22 }
 0x104   : > { %1054 = vlog2.f32 %v506_v23  ;;  %v510_v25 = vadd.f32 1.0, %v509_v24  ;;  %vm513_vm3 = vcmp.lt.f32.partialorder %v512_v26, 0.0004427343  ;;  %v916_v24 = vld [vmem:[%s1376_s7] ss:$0 sm:$0xff] }
 0x106   : > { %v511_v29 = vmul.f32 %v1053_v22, %v510_v25 }
 0x10e   : > { %v1055_v27 = vpop.eup %1054 }
 0x10f   : > { %v508_v28 = vmul.f32 0.6931472, %v1055_v27 }
 0x111   : > { %v514_v31 = vsel %vm513_vm3, %v511_v29, %v508_v28 }
 0x112   : > { %v515_v32 = vsub.f32 %v501_v30, %v514_v31 }
 0x114   : > { %961 = vmatpush3.msra.mxu0 %v515_v32 }
 0x115   : > { %963 = vmatmul.mubr.msk.f32.vlgmr.msra.gmra.mrb[2].mxu0 %vm518_vm4, %v516_v33  ;;  %989 = vmatprep.subr.bf16.mxu0 %v1142_v3  ;;  %v730_v3 = vld [vmem:[%s1375_s6] sm:$0xff] }
 0x116   : > { %974 = vmatprep.mubr.msk.f32.mxu0 %vm1143_vm0, %v1144_v6  ;;  %v990_v5 = vpack.c.bf16 %v731_v4, %v730_v3  ;;  %v1146_v6 = vmov 1966171168  }
 0x117   : > { %v712_v7 = vunpack.c.l.s4 %v1146_v6 }
 0x118   : > { %991 = vmatpush3.bf16.msra.mxu0 %v990_v5 }
 0x119   : > { %v713_v9 = vunpack.c.0.s8 %v712_v7 }
 0x11b   : > { %v716_v10 = vsub.s32 %v713_v9, %v613_v50 }
 0x1e8   : > { %v588_v40 = vpop.f32.mrb[2].mxu0 }
 0x1e9   : > { %v598_v41 = vadd.f32 %v913_v38, %v588_v40  ;;  %v964_v42 = vpop.f32.mrb[3].mxu0 }
 0x1eb   : > { %v599_v43 = vsub.f32 %v498_v39, %v598_v41  ;;  %706 = vst.msk [vmem:[#allocation2 - $0x7] sm:$0x80] %vm705_vm5, %v598_v41 }
 0x1ed   : > { %v603_v44 = vsel %vm602_vm6, %v599_v43, -inf }
 0x1ee   : > { %v604_v45 = vrot.slane %v603_v44, 4 }
 0x1f0   : > { %v605_v46 = vmax.f32 %v603_v44, %v604_v45 }
 0x1f2   : > { %v606_v48 = vrot.slane %v605_v46, 2 }
 0x1f4   : > { %v607_v49 = vmax.f32 %v605_v46, %v606_v48 }
 0x1f6   : > { %v608_v51 = vrot.slane %v607_v49, 1 }
 0x1f8   : > { %v609_v53 = vmax.f32 %v607_v49, %v608_v51 }
 0x1fa   : > { %v610_v55 = vmax.f32 %v600_v52, %v609_v53 }
 0x1fc   : > { %v615_v56 = vrot.slane %v610_v55, %v614_v54  ;;  %v690_v57 = vsub.f32 %v600_v52, %v610_v55  ;;  %708 = vst.msk [vmem:[#allocation3] sm:$0x1] %vm330_vm2, %v610_v55 }
 0x1fe   : > { %v617_v58 = vsub.f32 %v599_v43, %v615_v56  ;;  %v691_v59 = vmul.f32 1.442695, %v690_v57  ;;  %v694_v60 = vadd.f32 %v615_v56, %v598_v41 }
 0x200   : > { %v618_v61 = vmul.f32 1.442695, %v617_v58  ;;  %1056 = vpow2.f32 %v691_v59 }
 0x202   : > { %1058 = vpow2.f32 %v618_v61 }
 0x20a   : > { %v1057_v63 = vpop.eup %1056 }
 0x20b   : > { %v693_v0 = vmul.f32 %v1057_v63, %v601_v62 }
 0x20c   : > { %v1059_v1 = vpop.eup %1058 }
 0x20d   : > { %966 = vmatpush3.msra.mxu1 %v1059_v1  ;;  %v699_v2 = vrot.slane %v693_v0, %v614_v54 }
 0x20e   : > { %968 = vmatmul.mubr.msk.f32.vlgmr.msra.gmra.mrb[2].mxu1 %vm518_vm4, %v516_v33 }
 0x2e1   : > { %v686_v11 = vpop.f32.mrb[2].mxu1 }
 0x2e2   : > { %v701_v12 = vadd.f32 %v699_v2, %v686_v11  ;;  %v710_v13 = vcombine.high %v686_v11, %v686_v11  ;;  %v969_v14 = vpop.f32.mrb[3].mxu1 }
 0x2e4   : > { %1060 = vlog2.f32 %v701_v12  ;;  %v717_v15 = vrot.slane %v710_v13, %v716_v10 }
 0x2e6   : > { %v718_v16 = vcombine.high %v717_v15, %v717_v15 }
 0x2e8   : > { %v725_v17 = vrot.slane %v718_v16, %v716_v10 }
 0x2ea   : > { %v726_v18 = vcombine.high %v725_v17, %v725_v17 }
 0x2ec   : > { %v728_v19 = vadd.f32 %v726_v18, %v693_v0 }
 0x2ee   : > { %v1061_v20 = vpop.eup %1060  ;;  %729 = vst.msk [vmem:[#allocation4] sm:$0x1] %vm330_vm2, %v728_v19 }
 0x2ef   : > { %v703_v21 = vmul.f32 0.6931472, %v1061_v20 }
 0x2f1   : > { %v704_v22 = vadd.f32 %v703_v21, %v694_v60 }
 0x2f3   : > { %975 = vmatmul.mubr.msk.f32.vlgmr.msra.gmra.mrb[4].mxu0 %vm602_vm6, %v704_v22 }
 0x3c6   : > { %v801_v23 = vpop.f32.mrb[4].mxu0 }
 0x3c7   : > { %v805_v25 = vadd.f32 %v801_v23, %v1267_v8  ;;  %v976_v26 = vpop.f32.mrb[5].mxu0 }
 0x3c9   : > { %v813_v27 = vadd.f32 %v916_v24, %v805_v25 }
 0x3cb   : > { %814 = vst.msk [vmem:[%s318_s19] sm:$0xff] %vm346_vm1, %v813_v27 }
 0x3cc   : > { %1075 = shalt.err (!%p1072_p5)
}
 0x3cd   : > { %s1076_s26 = scalar_lea.hbm %s1321_s23, 128  ;;  %s1080_s19 = scalar_lea.hbm %s1377_s8, 256 }
 0x3ce   : > { %p1077_p6 = scmp.ne.s32.totalorder %s1321_s23, %s1076_s26  ;;  %p1081_p10 = scmp.lt.u32.totalorder %s1321_s23, %s1377_s8 }
 0x3cf   : > { %p1082_p11 = scmp.lt.u32.totalorder %s1080_s19, %s1076_s26  ;;  %p1084_p13 = scmp.lt.u32.totalorder %s1076_s26, %s1321_s23 }
 0x3d0   : > { %p1078_p7 = pnand %p1077_p6, %p1233_p4 }
 0x3d1   : > { %p1083_p12 = por %p1082_p11, %p1081_p10 }
 0x3d2   : > { %p1079_p9 = pneg %p1078_p7 }
 0x3d3   : > { %p1085_p0 = por %p1084_p13, %p1083_p12 }
 0x3d5   : > { %p1086_p1 = pnand %p1085_p0, %p1079_p9 }
 0x3d7   : > { %1089 = shalt.err (!%p1086_p1)
}
 0x3d8   : > { %992 = dma.vmem_to_hbm [thread:$0]  (%p1233_p4), %s1323_s20, 128, %s1321_s23, %s816_s24  }
 0x3d9 PF: > { %p998_p2 = scmp.ge.s32.totalorder %s1140_s10, 2  ;;  %s842_s30 = sand.u32 1, %s1120_s27  }
 0x3da   : > { %s843_s25 = scalar_lea.sflag [#allocation6], %s842_s30 }
 0x3db   : > { %p995_p3 = pnand %p998_p2, %p1240_p8 }
 0x3dd   : > { %1115 = dma.done.wait (!%p995_p3), %s843_s25, 128  }
 0x3de   : > { %1117 = vsyncadd (!%p995_p3), %s843_s25, 4294967168  ;;  %s21_s10 = sadd.s32 1, %s1140_s10   ;;  %s1380_s27 = smov %s1124_s28 }
 0x3df   : > { %p18_p5 = scmp.ge.s32.totalorder %s21_s10, 4   ;;  %s1381_s28 = smov %s1128_s29 }
 0x3e0   : > { %s1382_s29 = smov %s1246_s18  ;;  %s1383_s30 = smov %s1136_s9 }
 0x3e1   : > { %s1384_s9 = smov %s1386_s13  ;;  %20 = sbr.rel (!%p18_p5) target bundleno = 4 (0x4), region = 91 }
 0x3e8   :  { %848 = vsyncpa [#allocation6], 1 }
 0x3e9   :  { %850 = vsyncpa [#allocation6 + $0x1], 1 }

// kernel: tpu_custom_call.1
= control target key start
LH: loop header
LB: loop body
LE: loop exit
PB: predicated region body
PF: predicated region fallthrough
CT: control target
= control target key end

     0   :  { %13 = vsyncpa [#allocation6], 0  ;;  %s1369_s0 = inlined_call_operand.vmem [shape: f32[8,8], index: 0, kind: input, shape index: {}]   ;;  %s1370_s1 = inlined_call_operand.vmem [shape: f32[2,8,32], index: 1, kind: input, shape index: {}]   ;;  %s1371_s2 = inlined_call_operand.vmem [shape: f32[32,16], index: 2, kind: input, shape index: {}]   ;;  %s1372_s3 = inlined_call_operand.vmem [shape: f32[32,16], index: 3, kind: input, shape index: {}]   ;;  %s1373_s4 = inlined_call_operand.vmem [shape: f32[1,16], index: 4, kind: input, shape index: {}]   ;;  %s1374_s5 = inlined_call_operand.vmem [shape: f32[1,16], index: 5, kind: input, shape index: {}]   ;;  %s1375_s6 = inlined_call_operand.vmem [shape: f32[16,32], index: 6, kind: input, shape index: {}]   ;;  %s1376_s7 = inlined_call_operand.vmem [shape: f32[1,32], index: 7, kind: input, shape index: {}]   ;;  %s1377_s8 = inlined_call_operand.hbm [shape: f32[2,8,32], index: 8, kind: output, shape index: {}]  }
   0x1   :  { %15 = vsyncpa [#allocation6 + $0x1], 0  ;;  %s1193_s27 = smov 0   ;;  %s1195_s28 = smov 0  }
   0x2   :  { %s1197_s29 = smov 0   ;;  %s1199_s30 = smov 0  }
   0x3   :  { %s1201_s9 = smov 0   ;;  %s1203_s10 = smov 0  }
   0x4 LB: > { %s901_s11 = sadd.s32 4294967295, %s1140_s10   ;;  %s902_s12 = sadd.s32 4294967294, %s1140_s10   ;;  %s1140_s10 = sphi %s1203_s10, %s21_s10   ;;  %s1136_s9 = sphi %s1201_s9, %s1384_s9   ;;  %s1132_s30 = sphi %s1199_s30, %s1383_s30   ;;  %s1128_s29 = sphi %s1197_s29, %s1382_s29   ;;  %s1124_s28 = sphi %s1195_s28, %s1381_s28   ;;  %s1120_s27 = sphi %s1193_s27, %s1380_s27  }
   0x5   : > { %s33_s13 = sadd.s32 1, %s1136_s9  ;;  %s217_s14 = sadd.s32 1, %s1128_s29 }
   0x6   : > { %p35_p0 = scmp.ge.s32.totalorder %s33_s13, 2  ;;  %p227_p1 = scmp.ne.s32.totalorder %s1128_s29, %s1124_s28 }
   0x7   : > { %p228_p2 = scmp.eq.s32.totalorder %s901_s11, 1  ;;  %p233_p3 = scmp.ne.s32.totalorder %s1124_s28, %s1120_s27 }
   0x8   : > { %s1386_s13 = smov (%p35_p0, %s33_s13), 0  ;;  %p234_p5 = scmp.eq.s32.totalorder %s902_s12, 1 }
   0x9   : > { %p1233_p4 = por %p228_p2, %p227_p1  ;;  %s212_s16 = ssub.s32 %s1136_s9, %s1386_s13 }
   0xa   : > { %p905_p6 = scmp.ge.s32.totalorder %s1140_s10, 1  ;;  %p215_p7 = scmp.eq.s32.totalorder %s212_s16, 0 }
   0xb   : > { %p1240_p8 = por %p234_p5, %p233_p3  ;;  %p283_p9 = scmp.lt.s32.totalorder %s1140_s10, 3 }
   0xc   : > { %s1246_s18 = scalar_select %p215_p7, %s1128_s29, %s217_s14  }
   0xd   : > { %p284_p10 = pnand %p905_p6, %p283_p9 }
   0xe   : > { %v335_v0 = vld [vmem:[%s1371_s2] sm:$0xff] (!%p284_p10)  ;;  %v336_v1 = vld [vmem:[%s1371_s2 + $0x8] sm:$0xff] (!%p284_p10)  ;;  %v337_v2 = vld [vmem:[%s1371_s2 + $0x10] sm:$0xff] (!%p284_p10)  ;;  %v1142_v3 = vmov (!%p284_p10), 0.0|0.0   ;;  %vm1143_vm0 = vmmov (!%p284_p10), 0   ;;  %v1144_v6 = vmov (!%p284_p10), 0.0   ;;  %v612_v47 = vlaneseq (!%p284_p10) }
   0xf   : > { %287 = sbr.rel (%p284_p10) target bundleno = 985 (0x3d9), region = 52  ;;  %977 = vmatprep.subr.bf16.mxu0 (!%p284_p10), %v1142_v3  ;;  %v978_v4 = vpack.c.bf16 (!%p284_p10), %v336_v1, %v335_v0  ;;  %v338_v5 = vld [vmem:[%s1371_s2 + $0x18] sm:$0xff] (!%p284_p10)  ;;  %946 = vmatprep.mubr.msk.f32.mxu0 (!%p284_p10), %vm1143_vm0, %v1144_v6  ;;  %p319_p11 = scmp.lt.s32.totalorder (!%p284_p10), %s1132_s30, 1  ;;  %vm346_vm1 = vcmask (!%p284_p10), 261120   ;;  %v420_v9 = vld [vmem:[%s1372_s3] sm:$0xff] (!%p284_p10)  ;;  %v421_v10 = vld [vmem:[%s1372_s3 + $0x8] sm:$0xff] (!%p284_p10) }
  0x10   : > { %983 = vmatprep.subr.bf16.mxu1 (!%p284_p10), %v1142_v3  ;;  %957 = vmatprep.mubr.msk.f32.mxu1 (!%p284_p10), %vm1143_vm0, %v1144_v6  ;;  %v981_v7 = vpack.c.bf16 (!%p284_p10), %v338_v5, %v337_v2  ;;  %v984_v11 = vpack.c.bf16 (!%p284_p10), %v421_v10, %v420_v9  ;;  %v422_v12 = vld [vmem:[%s1372_s3 + $0x10] sm:$0xff] (!%p284_p10)  ;;  %v423_v13 = vld [vmem:[%s1372_s3 + $0x18] sm:$0xff] (!%p284_p10)  ;;  %vm330_vm2 = vcmask (!%p284_p10), 122880   ;;  %v908_v15 = vld [vmem:[%s1373_s4] ss:$0 sm:$0xff] (!%p284_p10)  ;;  %vm518_vm4 = vcmask (!%p284_p10), 64512  }
  0x11   : > { %979 = vmatpush3.bf16.msra.mxu0 (!%p284_p10), %v978_v4  ;;  %v987_v14 = vpack.c.bf16 (!%p284_p10), %v423_v13, %v422_v12  ;;  %331 = vst.msk [vmem:[#allocation2] sm:$0x1] (!%p284_p10), %vm330_vm2, %v1144_v6  ;;  %332 = vst.msk [vmem:[#allocation3] sm:$0x1] (!%p284_p10), %vm330_vm2, %v1144_v6  ;;  %v516_v33 = vld [vmem:[%s1369_s0] sm:$0xff] (!%p284_p10)  ;;  %v1145_v36 = vmov (!%p284_p10), 1.0  }
  0x12   : > { %980 = vmatprep.subr.bf16.mxu0 (!%p284_p10), %v1142_v3  ;;  %985 = vmatpush3.bf16.msra.mxu1 (!%p284_p10), %v984_v11  ;;  %333 = vst.msk [vmem:[#allocation4] sm:$0x1] (!%p284_p10), %vm330_vm2, %v1145_v36  ;;  %v910_v37 = vld [vmem:[%s1374_s5] ss:$0 sm:$0xff] (!%p284_p10)  ;;  %vm705_vm5 = vcmask (!%p284_p10), 130055   ;;  %vm602_vm6 = vcmask (!%p284_p10), 130048  }
  0x13   : > { %986 = vmatprep.subr.bf16.mxu1 (!%p284_p10), %v1142_v3  ;;  %v613_v50 = vshrl.u32 (!%p284_p10), %v612_v47, 7  ;;  %v731_v4 = vld [vmem:[%s1375_s6 + $0x8] sm:$0xff] (!%p284_p10)  ;;  %s316_s26 = sand.u32 (!%p284_p10), 1, %s1124_s28   ;;  %s918_s16 = sshll.u32 (!%p284_p10), %s1132_s30, 7 }
  0x14   : > { %s1321_s23 = scalar_lea.hbm (!%p284_p10), %s1377_s8, %s918_s16  ;;  %s816_s24 = scalar_lea.sflag (!%p284_p10), [#allocation6], %s316_s26 }
  0x15   : > { %982 = vmatpush3.bf16.msra.mxu0 (!%p284_p10), %v981_v7  ;;  %v614_v54 = vsub.s32 (!%p284_p10), 0, %v613_v50  ;;  %s1147_s25 = smov (!%p284_p10), [#allocation5]  }
  0x16   : > { %s320_s11 = scalar_select %p319_p11, %s1132_s30, 1  ;;  %960 = vmatprep.subr.mxu0 %v1144_v6  ;;  %988 = vmatpush3.bf16.msra.mxu1 %v987_v14 }
  0x17   : > { %965 = vmatprep.subr.mxu1 %v1144_v6 }
  0x18   : > { %s907_s12 = sshll.u32 %s320_s11, 3  ;;  %v913_v38 = vld [vmem:[#allocation2] ss:$0 sm:$0xff]  ;;  %v600_v52 = vld [vmem:[#allocation3] sm:$0x1]  ;;  %s906_s11 = sshll.u32 %s316_s26, 3 }
  0x19   : > { %s325_s19 = scalar_lea.vmem %s1370_s1, %s907_s12  ;;  %v601_v62 = vld [vmem:[#allocation4] sm:$0x1] }
  0x1a   : > { %v1267_v8 = vld [vmem:[%s325_s19] sm:$0xff]  ;;  %s318_s19 = scalar_lea.vmem [#allocation5], %s906_s11  ;;  %s1066_s11 = sshll.u32 %s1147_s25, 4  ;;  %s1067_s11 = int_to_ptr.vmem [resolvable:$false] %s1066_s11 }
  0x1b   : > { %947 = vmatmul.mubr.msk.f32.vlgmr.msra.gmra.mrb[0].mxu0 %vm346_vm1, %v1267_v8  ;;  %958 = vmatmul.mubr.msk.f32.vlgmr.msra.gmra.mrb[0].mxu1 %vm346_vm1, %v1267_v8  ;;  %s830_s20 = sshll.u32 %s318_s19, 4  ;;  %s1068_s12 = scalar_lea.vmem %s1067_s11, 256  ;;  %s1323_s20 = int_to_ptr.vmem [resolvable:$true] %s830_s20 }
  0x1c   : > { %962 = vmatprep.mubr.msk.f32.mxu0 %vm1143_vm0, %v1144_v6  ;;  %967 = vmatprep.mubr.msk.f32.mxu1 %vm1143_vm0, %v1144_v6  ;;  %s1062_s30 = scalar_lea.vmem %s1323_s20, 128  ;;  %p1069_p1 = scmp.lt.s32.totalorder %s1323_s20, %s1067_s11 }
  0x1d   : > { %p1063_p12 = scmp.ne.s32.totalorder %s1323_s20, %s1062_s30  ;;  %p1070_p2 = scmp.lt.s32.totalorder %s1068_s12, %s1062_s30 }
  0x1f   : > { %p1064_p13 = pnand %p1063_p12, %p1233_p4  ;;  %p1071_p3 = por %p1070_p2, %p1069_p1 }
  0x21   : > { %p1065_p0 = pneg %p1064_p13 }
  0x23   : > { %p1072_p5 = pnand %p1071_p3, %p1065_p0 }
  0xee   : > { %v416_v16 = vpop.f32.mrb[0].mxu0  ;;  %v497_v34 = vpop.f32.mrb[0].mxu1 }
  0xef   : > { %v417_v17 = vadd.f32 %v908_v15, %v416_v16  ;;  %v948_v18 = vpop.f32.mrb[1].mxu0  ;;  %v959_v35 = vpop.f32.mrb[1].mxu1  ;;  %v498_v39 = vadd.f32 %v910_v37, %v497_v34 }
  0xf1   : > { %v502_v19 = vand.u32 2147483647, %v417_v17  ;;  %v501_v30 = vmin.f32 %v417_v17, 0.0 }
  0xf3   : > { %v503_v20 = vsub.f32 0.0, %v502_v19 }
  0xf5   : > { %v504_v21 = vmul.f32 1.442695, %v503_v20 }
  0xf7   : > { %1052 = vpow2.f32 %v504_v21 }
 0x101   : > { %v1053_v22 = vpop.eup %1052 }
 0x102   : > { %v506_v23 = vadd.f32 1.0, %v1053_v22  ;;  %v509_v24 = vmul.f32 -0.5, %v1053_v22  ;;  %v512_v26 = vand.u32 2147483647, %v1053_v22 }
 0x104   : > { %1054 = vlog2.f32 %v506_v23  ;;  %v510_v25 = vadd.f32 1.0, %v509_v24  ;;  %vm513_vm3 = vcmp.lt.f32.partialorder %v512_v26, 0.0004427343  ;;  %v916_v24 = vld [vmem:[%s1376_s7] ss:$0 sm:$0xff] }
 0x106   : > { %v511_v29 = vmul.f32 %v1053_v22, %v510_v25 }
 0x10e   : > { %v1055_v27 = vpop.eup %1054 }
 0x10f   : > { %v508_v28 = vmul.f32 0.6931472, %v1055_v27 }
 0x111   : > { %v514_v31 = vsel %vm513_vm3, %v511_v29, %v508_v28 }
 0x112   : > { %v515_v32 = vsub.f32 %v501_v30, %v514_v31 }
 0x114   : > { %961 = vmatpush3.msra.mxu0 %v515_v32 }
 0x115   : > { %963 = vmatmul.mubr.msk.f32.vlgmr.msra.gmra.mrb[2].mxu0 %vm518_vm4, %v516_v33  ;;  %989 = vmatprep.subr.bf16.mxu0 %v1142_v3  ;;  %v730_v3 = vld [vmem:[%s1375_s6] sm:$0xff] }
 0x116   : > { %974 = vmatprep.mubr.msk.f32.mxu0 %vm1143_vm0, %v1144_v6  ;;  %v990_v5 = vpack.c.bf16 %v731_v4, %v730_v3  ;;  %v1146_v6 = vmov 1966171168  }
 0x117   : > { %v712_v7 = vunpack.c.l.s4 %v1146_v6 }
 0x118   : > { %991 = vmatpush3.bf16.msra.mxu0 %v990_v5 }
 0x119   : > { %v713_v9 = vunpack.c.0.s8 %v712_v7 }
 0x11b   : > { %v716_v10 = vsub.s32 %v713_v9, %v613_v50 }
 0x1e8   : > { %v588_v40 = vpop.f32.mrb[2].mxu0 }
 0x1e9   : > { %v598_v41 = vadd.f32 %v913_v38, %v588_v40  ;;  %v964_v42 = vpop.f32.mrb[3].mxu0 }
 0x1eb   : > { %v599_v43 = vsub.f32 %v498_v39, %v598_v41  ;;  %706 = vst.msk [vmem:[#allocation2 - $0x7] sm:$0x80] %vm705_vm5, %v598_v41 }
 0x1ed   : > { %v603_v44 = vsel %vm602_vm6, %v599_v43, -inf }
 0x1ee   : > { %v604_v45 = vrot.slane %v603_v44, 4 }
 0x1f0   : > { %v605_v46 = vmax.f32 %v603_v44, %v604_v45 }
 0x1f2   : > { %v606_v48 = vrot.slane %v605_v46, 2 }
 0x1f4   : > { %v607_v49 = vmax.f32 %v605_v46, %v606_v48 }
 0x1f6   : > { %v608_v51 = vrot.slane %v607_v49, 1 }
 0x1f8   : > { %v609_v53 = vmax.f32 %v607_v49, %v608_v51 }
 0x1fa   : > { %v610_v55 = vmax.f32 %v600_v52, %v609_v53 }
 0x1fc   : > { %v615_v56 = vrot.slane %v610_v55, %v614_v54  ;;  %v690_v57 = vsub.f32 %v600_v52, %v610_v55  ;;  %708 = vst.msk [vmem:[#allocation3] sm:$0x1] %vm330_vm2, %v610_v55 }
 0x1fe   : > { %v617_v58 = vsub.f32 %v599_v43, %v615_v56  ;;  %v691_v59 = vmul.f32 1.442695, %v690_v57  ;;  %v694_v60 = vadd.f32 %v615_v56, %v598_v41 }
 0x200   : > { %v618_v61 = vmul.f32 1.442695, %v617_v58  ;;  %1056 = vpow2.f32 %v691_v59 }
 0x202   : > { %1058 = vpow2.f32 %v618_v61 }
 0x20a   : > { %v1057_v63 = vpop.eup %1056 }
 0x20b   : > { %v693_v0 = vmul.f32 %v1057_v63, %v601_v62 }
 0x20c   : > { %v1059_v1 = vpop.eup %1058 }
 0x20d   : > { %966 = vmatpush3.msra.mxu1 %v1059_v1  ;;  %v699_v2 = vrot.slane %v693_v0, %v614_v54 }
 0x20e   : > { %968 = vmatmul.mubr.msk.f32.vlgmr.msra.gmra.mrb[2].mxu1 %vm518_vm4, %v516_v33 }
 0x2e1   : > { %v686_v11 = vpop.f32.mrb[2].mxu1 }
 0x2e2   : > { %v701_v12 = vadd.f32 %v699_v2, %v686_v11  ;;  %v710_v13 = vcombine.high %v686_v11, %v686_v11  ;;  %v969_v14 = vpop.f32.mrb[3].mxu1 }
 0x2e4   : > { %1060 = vlog2.f32 %v701_v12  ;;  %v717_v15 = vrot.slane %v710_v13, %v716_v10 }
 0x2e6   : > { %v718_v16 = vcombine.high %v717_v15, %v717_v15 }
 0x2e8   : > { %v725_v17 = vrot.slane %v718_v16, %v716_v10 }
 0x2ea   : > { %v726_v18 = vcombine.high %v725_v17, %v725_v17 }
 0x2ec   : > { %v728_v19 = vadd.f32 %v726_v18, %v693_v0 }
 0x2ee   : > { %v1061_v20 = vpop.eup %1060  ;;  %729 = vst.msk [vmem:[#allocation4] sm:$0x1] %vm330_vm2, %v728_v19 }
 0x2ef   : > { %v703_v21 = vmul.f32 0.6931472, %v1061_v20 }
 0x2f1   : > { %v704_v22 = vadd.f32 %v703_v21, %v694_v60 }
 0x2f3   : > { %975 = vmatmul.mubr.msk.f32.vlgmr.msra.gmra.mrb[4].mxu0 %vm602_vm6, %v704_v22 }
 0x3c6   : > { %v801_v23 = vpop.f32.mrb[4].mxu0 }
 0x3c7   : > { %v805_v25 = vadd.f32 %v801_v23, %v1267_v8  ;;  %v976_v26 = vpop.f32.mrb[5].mxu0 }
 0x3c9   : > { %v813_v27 = vadd.f32 %v916_v24, %v805_v25 }
 0x3cb   : > { %814 = vst.msk [vmem:[%s318_s19] sm:$0xff] %vm346_vm1, %v813_v27 }
 0x3cc   : > { %1075 = shalt.err (!%p1072_p5)
}
 0x3cd   : > { %s1076_s26 = scalar_lea.hbm %s1321_s23, 128  ;;  %s1080_s19 = scalar_lea.hbm %s1377_s8, 256 }
 0x3ce   : > { %p1077_p6 = scmp.ne.s32.totalorder %s1321_s23, %s1076_s26  ;;  %p1081_p10 = scmp.lt.u32.totalorder %s1321_s23, %s1377_s8 }
 0x3cf   : > { %p1082_p11 = scmp.lt.u32.totalorder %s1080_s19, %s1076_s26  ;;  %p1084_p13 = scmp.lt.u32.totalorder %s1076_s26, %s1321_s23 }
 0x3d0   : > { %p1078_p7 = pnand %p1077_p6, %p1233_p4 }
 0x3d1   : > { %p1083_p12 = por %p1082_p11, %p1081_p10 }
 0x3d2   : > { %p1079_p9 = pneg %p1078_p7 }
 0x3d3   : > { %p1085_p0 = por %p1084_p13, %p1083_p12 }
 0x3d5   : > { %p1086_p1 = pnand %p1085_p0, %p1079_p9 }
 0x3d7   : > { %1089 = shalt.err (!%p1086_p1)
}
 0x3d8   : > { %992 = dma.vmem_to_hbm [thread:$0]  (%p1233_p4), %s1323_s20, 128, %s1321_s23, %s816_s24  }
 0x3d9 PF: > { %p998_p2 = scmp.ge.s32.totalorder %s1140_s10, 2  ;;  %s842_s30 = sand.u32 1, %s1120_s27  }
 0x3da   : > { %s843_s25 = scalar_lea.sflag [#allocation6], %s842_s30 }
 0x3db   : > { %p995_p3 = pnand %p998_p2, %p1240_p8 }
 0x3dd   : > { %1115 = dma.done.wait (!%p995_p3), %s843_s25, 128  }
 0x3de   : > { %1117 = vsyncadd (!%p995_p3), %s843_s25, 4294967168  ;;  %s21_s10 = sadd.s32 1, %s1140_s10   ;;  %s1380_s27 = smov %s1124_s28 }
 0x3df   : > { %p18_p5 = scmp.ge.s32.totalorder %s21_s10, 4   ;;  %s1381_s28 = smov %s1128_s29 }
 0x3e0   : > { %s1382_s29 = smov %s1246_s18  ;;  %s1383_s30 = smov %s1136_s9 }
 0x3e1   : > { %s1384_s9 = smov %s1386_s13  ;;  %20 = sbr.rel (!%p18_p5) target bundleno = 4 (0x4), region = 91 }
 0x3e8   :  { %848 = vsyncpa [#allocation6], 1 }
 0x3e9   :  { %850 = vsyncpa [#allocation6 + $0x1], 1 }

</bundles_post_ra>
